<compile_context>
chip_gen: v7x
topology: tpu7x:2x2x1
jax: 0.10.0
libtpu: 0.0.40
codegen_flags: <defaults>
</compile_context>

<pallas_src>
import jax
import jax.numpy as jnp
from jax.experimental import pallas as pl
from jax.experimental.pallas import tpu as pltpu

INPUT_DIM = 30
HIDDEN_DIMS = [128, 128, 64, 64, 32]
OUT_DIM = 2
N_LAYERS = len(HIDDEN_DIMS) + 1      # 6 linear layers
N_MID = N_LAYERS - 2                 # layers 1..4 (128-padded square stack)
PAD = 128                            # lane width for hidden activations / output
B_SUB = 8                            # sublane granularity (bias rows)
TILE_ALIGN = 128                     # batch-tile alignment (lane/bf16 friendly)
MAX_TILE = 1024                      # max batch rows per grid step (sweepable)


def _round_up(n, m):
    return (n + m - 1) // m * m


def _mlp_kernel(x_ref, w0_ref, wmid_ref, whead_ref, b_ref, out_ref):
    """Fused MLP for one (TB, INPUT_DIM) batch tile. bf16 dots, f32 accumulate."""
    # Layer 0: (TB, 30)bf16 @ (30, 128)bf16 -> f32.
    h = jnp.dot(x_ref[...], w0_ref[...], preferred_element_type=jnp.float32)
    h = jnp.maximum(h + b_ref[0:1, :], 0.0)                # f32 elementwise

    # Layers 1..4: 128x128 zero-padded square bf16 weights (exact padding).
    for i in range(N_MID):
        h = jnp.dot(h.astype(jnp.bfloat16), wmid_ref[i],
                    preferred_element_type=jnp.float32)
        h = jnp.maximum(h + b_ref[i + 1:i + 2, :], 0.0)

    # Head: (TB, 128) @ (128, 128); columns >= OUT_DIM are zero.  No ReLU.
    logits = jnp.dot(h.astype(jnp.bfloat16), whead_ref[...],
                     preferred_element_type=jnp.float32)
    # Bias row N_LAYERS-1 is zero beyond lane OUT_DIM, so padded lanes stay 0.
    out_ref[...] = logits + b_ref[N_LAYERS - 1:N_LAYERS, :]


def init_params(key):
    """PyTorch-style init: U(-1/sqrt(fan_in), 1/sqrt(fan_in)). f32 (w, b) list."""
    dims = [INPUT_DIM] + HIDDEN_DIMS + [OUT_DIM]
    params = []
    for i in range(len(dims) - 1):
        fan_in, fan_out = dims[i], dims[i + 1]
        key, kw, kb = jax.random.split(key, 3)
        bound = 1.0 / jnp.sqrt(fan_in)
        w = jax.random.uniform(kw, (fan_in, fan_out), jnp.float32, -bound, bound)
        b = jax.random.uniform(kb, (fan_out,), jnp.float32, -bound, bound)
        params.append((w, b))
    return params


def pack_params(params):
    """One-time packing (hoisted out of the per-call path)."""
    ws = [w for w, _ in params]
    bs = [b for _, b in params]

    w0 = ws[0].astype(jnp.bfloat16)                                # (30, 128)

    wmid = jnp.zeros((N_MID, PAD, PAD), jnp.bfloat16)
    for i in range(N_MID):
        w = ws[i + 1]
        wmid = wmid.at[i, :w.shape[0], :w.shape[1]].set(w.astype(jnp.bfloat16))

    # Head weight zero-padded to (128, 128) -> lane-dense output stores.
    whead = jnp.zeros((PAD, PAD), jnp.bfloat16)
    whead = whead.at[:ws[-1].shape[0], :ws[-1].shape[1]].set(
        ws[-1].astype(jnp.bfloat16))

    b_all = jnp.zeros((B_SUB, PAD), jnp.float32)
    for i, b in enumerate(bs):
        b_all = b_all.at[i, :b.shape[0]].set(b)

    return w0, wmid, whead, b_all


def _choose_tile(B, max_tile):
    """128-aligned batch tile; >=2 grid steps when B > 128 (v7x: 2 TCs)."""
    target = _round_up(pl.cdiv(B, 2), TILE_ALIGN)
    return max(TILE_ALIGN, min(max_tile, target))


def xvector_forward(x, packed, *, max_tile=MAX_TILE):
    """x: (B, INPUT_DIM) f32 -> logits (B, OUT_DIM) f32."""
    w0, wmid, whead, b_all = packed
    B = x.shape[0]
    tb = _choose_tile(B, max_tile)
    b_pad = _round_up(B, tb)

    x_p = x.astype(jnp.bfloat16)                 # halve input DMA bytes
    if b_pad != B:
        x_p = jnp.pad(x_p, ((0, b_pad - B), (0, 0)))

    out = pl.pallas_call(
        _mlp_kernel,
        grid=(b_pad // tb,),
        in_specs=[
            pl.BlockSpec((tb, INPUT_DIM), lambda i: (i, 0)),        # x tile
            pl.BlockSpec((INPUT_DIM, PAD), lambda i: (0, 0)),       # W0 (resident)
            pl.BlockSpec((N_MID, PAD, PAD), lambda i: (0, 0, 0)),   # W1..W4 stack
            pl.BlockSpec((PAD, PAD), lambda i: (0, 0)),             # head W (padded)
            pl.BlockSpec((B_SUB, PAD), lambda i: (0, 0)),           # biases
        ],
        out_specs=pl.BlockSpec((tb, PAD), lambda i: (i, 0)),        # lane-dense
        out_shape=jax.ShapeDtypeStruct((b_pad, PAD), jnp.float32),
        compiler_params=pltpu.CompilerParams(
            dimension_semantics=("parallel",),
        ),
    )(x_p, w0, wmid, whead, b_all)

    return out[:B, :OUT_DIM]


def _reference_forward(x, params):
    """Pure-JAX reference matching the kernel's bf16-operand / f32-accum math."""
    h = x
    for i, (w, b) in enumerate(params):
        h = jnp.dot(h.astype(jnp.bfloat16).astype(jnp.float32),
                    w.astype(jnp.bfloat16).astype(jnp.float32),
                    precision=jax.lax.Precision.HIGHEST) + b
        if i < len(params) - 1:
            h = jnp.maximum(h, 0.0)
    return h


if __name__ == "__main__":
    key = jax.random.PRNGKey(0)
    k_params, k_x, k_x2 = jax.random.split(key, 3)

    params = init_params(k_params)
    packed = pack_params(params)          # packed once, reused every call

    # Small batch (single grid step, tile=128).
    x = jax.random.normal(k_x, (4, INPUT_DIM), jnp.float32)
    out = jax.block_until_ready(xvector_forward(x, packed))
    ref = _reference_forward(x, params)
    assert out.shape == (4, OUT_DIM), out.shape
    assert jnp.allclose(out, ref, atol=2e-2, rtol=2e-2), (out, ref)

    # Larger batch (>=2 grid steps, padded edge rows, parallel batch axis).
    x_big = jax.random.normal(k_x2, (300, INPUT_DIM), jnp.float32)
    out_big = jax.block_until_ready(xvector_forward(x_big, packed))
    ref_big = _reference_forward(x_big, params)
    assert out_big.shape == (300, OUT_DIM), out_big.shape
    assert jnp.allclose(out_big, ref_big, atol=2e-2, rtol=2e-2)

    print("KERNEL_OK")
</pallas_src>

<mosaic_0001>
module attributes {stable_mosaic.version = 11 : i64} {
  func.func @_mlp_kernel(%arg0: i32, %arg1: memref<128x30xbf16, #tpu.memory_space<vmem>>, %arg2: memref<30x128xbf16, #tpu.memory_space<vmem>>, %arg3: memref<4x128x128xbf16, #tpu.memory_space<vmem>>, %arg4: memref<128x128xbf16, #tpu.memory_space<vmem>>, %arg5: memref<8x128xf32, #tpu.memory_space<vmem>>, %arg6: memref<128x128xf32, #tpu.memory_space<vmem>>) attributes {dimension_semantics = [#tpu.dimension_semantics<parallel>], iteration_bounds = array<i64: 1>, scalar_prefetch = 0 : i64, scratch_operands = 0 : i64, tpu.core_type = #tpu.core_type<tc>, window_params = [{transform_indices = @transform_0, window_bounds = array<i64: 128, 30>}, {pipeline_mode = #tpu.pipeline_mode<synchronous>, transform_indices = @transform_1, window_bounds = array<i64: 30, 128>}, {pipeline_mode = #tpu.pipeline_mode<synchronous>, transform_indices = @transform_2, window_bounds = array<i64: 4, 128, 128>}, {pipeline_mode = #tpu.pipeline_mode<synchronous>, transform_indices = @transform_3, window_bounds = array<i64: 128, 128>}, {pipeline_mode = #tpu.pipeline_mode<synchronous>, transform_indices = @transform_4, window_bounds = array<i64: 8, 128>}, {transform_indices = @transform_5, window_bounds = array<i64: 128, 128>}]} {
    %c0 = arith.constant 0 : index
    %c0_0 = arith.constant 0 : index
    %0 = vector.load %arg1[%c0, %c0_0] : memref<128x30xbf16, #tpu.memory_space<vmem>>, vector<128x30xbf16>
    %c0_1 = arith.constant 0 : index
    %c0_2 = arith.constant 0 : index
    %1 = vector.load %arg2[%c0_1, %c0_2] : memref<30x128xbf16, #tpu.memory_space<vmem>>, vector<30x128xbf16>
    %cst = arith.constant dense<0.000000e+00> : vector<128x128xf32>
    %2 = tpu.matmul %0, %1, %cst {dimension_numbers = #tpu.dot_dimension_numbers<[1], [0], [0], [1], [0, 0, 1, 1], [], []>} : vector<128x30xbf16>, vector<30x128xbf16>, vector<128x128xf32> -> vector<128x128xf32>
    %c0_3 = arith.constant 0 : index
    %c0_4 = arith.constant 0 : index
    %3 = vector.load %arg5[%c0_3, %c0_4] : memref<8x128xf32, #tpu.memory_space<vmem>>, vector<1x128xf32>
    %4 = vector.broadcast %3 : vector<1x128xf32> to vector<128x128xf32>
    %5 = arith.addf %2, %4 : vector<128x128xf32>
    %cst_5 = arith.constant 0.000000e+00 : f32
    %6 = vector.broadcast %cst_5 : f32 to vector<128x128xf32>
    %7 = arith.maximumf %5, %6 : vector<128x128xf32>
    %8 = arith.truncf %7 : vector<128x128xf32> to vector<128x128xbf16>
    %c0_6 = arith.constant 0 : index
    %c0_7 = arith.constant 0 : index
    %c0_8 = arith.constant 0 : index
    %9 = vector.load %arg3[%c0_6, %c0_7, %c0_8] : memref<4x128x128xbf16, #tpu.memory_space<vmem>>, vector<1x128x128xbf16>
    %10 = vector.shape_cast %9 : vector<1x128x128xbf16> to vector<128x128xbf16>
    %cst_9 = arith.constant dense<0.000000e+00> : vector<128x128xf32>
    %11 = tpu.matmul %8, %10, %cst_9 {dimension_numbers = #tpu.dot_dimension_numbers<[1], [0], [0], [1], [0, 0, 1, 1], [], []>} : vector<128x128xbf16>, vector<128x128xbf16>, vector<128x128xf32> -> vector<128x128xf32>
    %c1 = arith.constant 1 : index
    %c0_10 = arith.constant 0 : index
    %12 = vector.load %arg5[%c1, %c0_10] : memref<8x128xf32, #tpu.memory_space<vmem>>, vector<1x128xf32>
    %13 = vector.broadcast %12 : vector<1x128xf32> to vector<128x128xf32>
    %14 = arith.addf %11, %13 : vector<128x128xf32>
    %cst_11 = arith.constant 0.000000e+00 : f32
    %15 = vector.broadcast %cst_11 : f32 to vector<128x128xf32>
    %16 = arith.maximumf %14, %15 : vector<128x128xf32>
    %17 = arith.truncf %16 : vector<128x128xf32> to vector<128x128xbf16>
    %c1_12 = arith.constant 1 : index
    %c0_13 = arith.constant 0 : index
    %c0_14 = arith.constant 0 : index
    %18 = vector.load %arg3[%c1_12, %c0_13, %c0_14] : memref<4x128x128xbf16, #tpu.memory_space<vmem>>, vector<1x128x128xbf16>
    %19 = vector.shape_cast %18 : vector<1x128x128xbf16> to vector<128x128xbf16>
    %cst_15 = arith.constant dense<0.000000e+00> : vector<128x128xf32>
    %20 = tpu.matmul %17, %19, %cst_15 {dimension_numbers = #tpu.dot_dimension_numbers<[1], [0], [0], [1], [0, 0, 1, 1], [], []>} : vector<128x128xbf16>, vector<128x128xbf16>, vector<128x128xf32> -> vector<128x128xf32>
    %c2 = arith.constant 2 : index
    %c0_16 = arith.constant 0 : index
    %21 = vector.load %arg5[%c2, %c0_16] : memref<8x128xf32, #tpu.memory_space<vmem>>, vector<1x128xf32>
    %22 = vector.broadcast %21 : vector<1x128xf32> to vector<128x128xf32>
    %23 = arith.addf %20, %22 : vector<128x128xf32>
    %cst_17 = arith.constant 0.000000e+00 : f32
    %24 = vector.broadcast %cst_17 : f32 to vector<128x128xf32>
    %25 = arith.maximumf %23, %24 : vector<128x128xf32>
    %26 = arith.truncf %25 : vector<128x128xf32> to vector<128x128xbf16>
    %c2_18 = arith.constant 2 : index
    %c0_19 = arith.constant 0 : index
    %c0_20 = arith.constant 0 : index
    %27 = vector.load %arg3[%c2_18, %c0_19, %c0_20] : memref<4x128x128xbf16, #tpu.memory_space<vmem>>, vector<1x128x128xbf16>
    %28 = vector.shape_cast %27 : vector<1x128x128xbf16> to vector<128x128xbf16>
    %cst_21 = arith.constant dense<0.000000e+00> : vector<128x128xf32>
    %29 = tpu.matmul %26, %28, %cst_21 {dimension_numbers = #tpu.dot_dimension_numbers<[1], [0], [0], [1], [0, 0, 1, 1], [], []>} : vector<128x128xbf16>, vector<128x128xbf16>, vector<128x128xf32> -> vector<128x128xf32>
    %c3 = arith.constant 3 : index
    %c0_22 = arith.constant 0 : index
    %30 = vector.load %arg5[%c3, %c0_22] : memref<8x128xf32, #tpu.memory_space<vmem>>, vector<1x128xf32>
    %31 = vector.broadcast %30 : vector<1x128xf32> to vector<128x128xf32>
    %32 = arith.addf %29, %31 : vector<128x128xf32>
    %cst_23 = arith.constant 0.000000e+00 : f32
    %33 = vector.broadcast %cst_23 : f32 to vector<128x128xf32>
    %34 = arith.maximumf %32, %33 : vector<128x128xf32>
    %35 = arith.truncf %34 : vector<128x128xf32> to vector<128x128xbf16>
    %c3_24 = arith.constant 3 : index
    %c0_25 = arith.constant 0 : index
    %c0_26 = arith.constant 0 : index
    %36 = vector.load %arg3[%c3_24, %c0_25, %c0_26] : memref<4x128x128xbf16, #tpu.memory_space<vmem>>, vector<1x128x128xbf16>
    %37 = vector.shape_cast %36 : vector<1x128x128xbf16> to vector<128x128xbf16>
    %cst_27 = arith.constant dense<0.000000e+00> : vector<128x128xf32>
    %38 = tpu.matmul %35, %37, %cst_27 {dimension_numbers = #tpu.dot_dimension_numbers<[1], [0], [0], [1], [0, 0, 1, 1], [], []>} : vector<128x128xbf16>, vector<128x128xbf16>, vector<128x128xf32> -> vector<128x128xf32>
    %c4 = arith.constant 4 : index
    %c0_28 = arith.constant 0 : index
    %39 = vector.load %arg5[%c4, %c0_28] : memref<8x128xf32, #tpu.memory_space<vmem>>, vector<1x128xf32>
    %40 = vector.broadcast %39 : vector<1x128xf32> to vector<128x128xf32>
    %41 = arith.addf %38, %40 : vector<128x128xf32>
    %cst_29 = arith.constant 0.000000e+00 : f32
    %42 = vector.broadcast %cst_29 : f32 to vector<128x128xf32>
    %43 = arith.maximumf %41, %42 : vector<128x128xf32>
    %44 = arith.truncf %43 : vector<128x128xf32> to vector<128x128xbf16>
    %c0_30 = arith.constant 0 : index
    %c0_31 = arith.constant 0 : index
    %45 = vector.load %arg4[%c0_30, %c0_31] : memref<128x128xbf16, #tpu.memory_space<vmem>>, vector<128x128xbf16>
    %cst_32 = arith.constant dense<0.000000e+00> : vector<128x128xf32>
    %46 = tpu.matmul %44, %45, %cst_32 {dimension_numbers = #tpu.dot_dimension_numbers<[1], [0], [0], [1], [0, 0, 1, 1], [], []>} : vector<128x128xbf16>, vector<128x128xbf16>, vector<128x128xf32> -> vector<128x128xf32>
    %c5 = arith.constant 5 : index
    %c0_33 = arith.constant 0 : index
    %47 = vector.load %arg5[%c5, %c0_33] : memref<8x128xf32, #tpu.memory_space<vmem>>, vector<1x128xf32>
    %48 = vector.broadcast %47 : vector<1x128xf32> to vector<128x128xf32>
    %49 = arith.addf %46, %48 : vector<128x128xf32>
    %c0_34 = arith.constant 0 : index
    %c0_35 = arith.constant 0 : index
    %50 = vector.load %arg6[%c0_34, %c0_35] : memref<128x128xf32, #tpu.memory_space<vmem>>, vector<128x128xf32>
    tpu.vector_store %arg6[%c0_34, %c0_35], %49 {strides = array<i32>} : memref<128x128xf32, #tpu.memory_space<vmem>>, vector<128x128xf32>,
    return
  }
  func.func @transform_0(%arg0: i32) -> (i32, i32) {
    %c0_i32 = arith.constant 0 : i32
    %c0_i32_0 = arith.constant 0 : i32
    return %arg0, %c0_i32 : i32, i32
  }
  func.func @transform_1(%arg0: i32) -> (i32, i32) {
    %c0_i32 = arith.constant 0 : i32
    %c0_i32_0 = arith.constant 0 : i32
    %c0_i32_1 = arith.constant 0 : i32
    return %c0_i32, %c0_i32_0 : i32, i32
  }
  func.func @transform_2(%arg0: i32) -> (i32, i32, i32) {
    %c0_i32 = arith.constant 0 : i32
    %c0_i32_0 = arith.constant 0 : i32
    %c0_i32_1 = arith.constant 0 : i32
    %c0_i32_2 = arith.constant 0 : i32
    return %c0_i32, %c0_i32_0, %c0_i32_1 : i32, i32, i32
  }
  func.func @transform_3(%arg0: i32) -> (i32, i32) {
    %c0_i32 = arith.constant 0 : i32
    %c0_i32_0 = arith.constant 0 : i32
    %c0_i32_1 = arith.constant 0 : i32
    return %c0_i32, %c0_i32_0 : i32, i32
  }
  func.func @transform_4(%arg0: i32) -> (i32, i32) {
    %c0_i32 = arith.constant 0 : i32
    %c0_i32_0 = arith.constant 0 : i32
    %c0_i32_1 = arith.constant 0 : i32
    return %c0_i32, %c0_i32_0 : i32, i32
  }
  func.func @transform_5(%arg0: i32) -> (i32, i32) {
    %c0_i32 = arith.constant 0 : i32
    %c0_i32_0 = arith.constant 0 : i32
    return %arg0, %c0_i32 : i32, i32
  }
}

</mosaic_0001>

<bundles_post_ra>
// kernel: tpu_custom_call.1
= control target key start
LH: loop header
LB: loop body
LE: loop exit
PB: predicated region body
PF: predicated region fallthrough
CT: control target
= control target key end

     0   :  { %10 = vsyncpa [#allocation3], 0  ;;  %s1855_s0 = inlined_call_operand.vmem [shape: bf16[128,30], index: 0, kind: input, shape index: {}]   ;;  %s1856_s1 = inlined_call_operand.vmem [shape: bf16[30,128], index: 1, kind: input, shape index: {}]   ;;  %s1857_s2 = inlined_call_operand.hbm [shape: bf16[4,128,128], index: 2, kind: input, shape index: {}]   ;;  %s1858_s3 = inlined_call_operand.vmem [shape: bf16[128,128], index: 3, kind: input, shape index: {}]   ;;  %s1859_s4 = inlined_call_operand.vmem [shape: f32[8,128], index: 4, kind: input, shape index: {}]   ;;  %s1860_s5 = inlined_call_operand.hbm [shape: f32[128,128], index: 5, kind: output, shape index: {}]  }
   0x1   :  { %11 = vsyncpa [#allocation4], 0  ;;  %s1679_s18 = smov [#allocation2]   ;;  %s1631_s22 = scalar_lea.hbm %s1857_s2, 4096 }
   0x2   :  { %s21_s19 = sshll.u32 %s1679_s18, 4  ;;  %p1632_p0 = scmp.ne.s32.totalorder %s1857_s2, %s1631_s22  ;;  %s22_s19 = int_to_ptr.vmem [resolvable:$true] %s21_s19 }
   0x3   :  { %p1635_p1 = scmp.lt.u32.totalorder %s1631_s22, %s1857_s2 }
   0x5   :  { %p1637_p2 = pnand %p1635_p1, %p1632_p0 }
   0x7   :  { %1640 = shalt.err (!%p1637_p2)
}
   0x8   :  { %s1641_s27 = scalar_lea.vmem %s22_s19, 4096  ;;  %p1646_p4 = scmp.lt.s32.totalorder %s22_s19, %s22_s19 }
   0x9   :  { %p1642_p3 = scmp.ne.s32.totalorder %s22_s19, %s1641_s27  ;;  %p1647_p5 = scmp.lt.s32.totalorder %s1641_s27, %s1641_s27 }
   0xb   :  { %p1648_p6 = por %p1647_p5, %p1646_p4 }
   0xd   :  { %p1649_p7 = pnand %p1648_p6, %p1642_p3 }
   0xf   :  { %1652 = shalt.err (!%p1649_p7)
}
  0x10   :  { %s1680_s28 = smov 64   ;;  %s1681_s29 = smov 4  }
  0x11   :  { %27 = dma.hbm_to_vmem [thread:$0]  %s1857_s2, 4096, %s22_s19, [#allocation3], %s1680_s28, %s1680_s28, %s1681_s29  }
  0x12   :  { %1675 = dma.done.wait [#allocation3], 4096  }
  0x13   :  { %1676 = vsyncadd [#allocation3], 4294963200  ;;  %vm137_vm0 = vcmask 1046528   ;;  %v1581_v0 = vld [vmem:[%s1856_s1] sm:$0xff]   ;;  %vm112_vm1 = vcmask 244736   ;;  %v1584_v4 = vld [vmem:[%s1855_s0 + $0x8] sm:$0xff]  }
  0x14   :  { %v1582_v1 = vld [vmem:[%s1856_s1 + $0x8] sm:$0x7f]   ;;  %1378 = vmatprep.subr.bf16.mxu0 %v1581_v0  ;;  %v1583_v2 = vld [vmem:[%s1855_s0] sm:$0xff]   ;;  %v1585_v5 = vld [vmem:[%s1855_s0 + $0x10] sm:$0xff]  }
  0x15   :  { %1379 = vmatpush3.bf16.msra.mxu0 %v1581_v0  ;;  %v139_v3 = vsel %vm137_vm0, %v1582_v1, 0  ;;  %1382 = vmatprep.mubr.msk.bf16.mxu0 %vm112_vm1, %v1583_v2  ;;  %v1591_v6 = vld [vmem:[#allocation2] sm:$0xff]   ;;  %v1592_v7 = vld [vmem:[#allocation2 + $0x8] sm:$0xff]   ;;  %v1586_v8 = vld [vmem:[%s1855_s0 + $0x18] sm:$0xff]  }
  0x16   :  { %1574 = vmatprep.subr.msk.bf16.mxu0 %vm137_vm0, %v1582_v1  ;;  %1398 = vmatprep.subr.bf16.mxu1 %v1591_v6  ;;  %v1593_v9 = vld [vmem:[#allocation2 + $0x10] sm:$0xff]   ;;  %v1587_v10 = vld [vmem:[%s1855_s0 + $0x20] sm:$0xff]   ;;  %v1594_v11 = vld [vmem:[#allocation2 + $0x18] sm:$0xff]  }
  0x17   :  { %1399 = vmatpush3.bf16.msra.mxu1 %v1591_v6  ;;  %v1588_v12 = vld [vmem:[%s1855_s0 + $0x28] sm:$0xff]   ;;  %v1595_v13 = vld [vmem:[#allocation2 + $0x20] sm:$0xff]   ;;  %v1589_v14 = vld [vmem:[%s1855_s0 + $0x30] sm:$0xff]  }
  0x18   :  { %1400 = vmatprep.subr.bf16.mxu1 %v1592_v7  ;;  %v1596_v15 = vld [vmem:[#allocation2 + $0x28] sm:$0xff]   ;;  %v1590_v16 = vld [vmem:[%s1855_s0 + $0x38] sm:$0xff]   ;;  %v1597_v17 = vld [vmem:[#allocation2 + $0x30] sm:$0xff]  }
  0x19   :  { %1381 = vmatpush3.bf16.msra.mxu0 %v139_v3  ;;  %v1598_v18 = vld [vmem:[#allocation2 + $0x38] sm:$0xff]   ;;  %v1599_v19 = vld [vmem:[#allocation2 + $0x40] sm:$0xff]   ;;  %v1600_v20 = vld [vmem:[#allocation2 + $0x48] sm:$0xff]  }
  0x1a   :  { %1430 = vmatprep.subr.bf16.mxu0 %v1599_v19  ;;  %v1601_v21 = vld [vmem:[#allocation2 + $0x50] sm:$0xff]   ;;  %v1602_v22 = vld [vmem:[#allocation2 + $0x58] sm:$0xff]   ;;  %v1603_v23 = vld [vmem:[#allocation2 + $0x60] sm:$0xff]  }
  0x1b   :  { %1401 = vmatpush3.bf16.msra.mxu1 %v1592_v7  ;;  %v1604_v24 = vld [vmem:[#allocation2 + $0x68] sm:$0xff]   ;;  %v1224_v25 = vld [vmem:[%s1859_s4] ss:$0 sm:$0xff] }
  0x1c   :  { %1383 = vmatmul.mubr.msk.bf16.vlgmr.msra.gmra.mrb[0].mxu0 %vm112_vm1, %v1584_v4  ;;  %1402 = vmatprep.subr.bf16.mxu1 %v1593_v9 }
  0x1d   :  { %1386 = vmatprep.mubr.msk.bf16.mxu0 %vm112_vm1, %v1585_v5  ;;  %1431 = vmatpush3.bf16.msra.mxu0 %v1599_v19  ;;  %v1606_v19 = vld [vmem:[#allocation2 + $0x78] sm:$0xff]  }
  0x1e   :  { %1432 = vmatprep.subr.bf16.mxu0 %v1600_v20 }
  0x1f   :  { %1403 = vmatpush3.bf16.msra.mxu1 %v1593_v9 }
  0x20   :  { %1404 = vmatprep.subr.bf16.mxu1 %v1594_v11 }
  0x21   :  { %1433 = vmatpush3.bf16.msra.mxu0 %v1600_v20  ;;  %v1607_v20 = vld [vmem:[#allocation2 + $0x80] sm:$0xff]  }
  0x22   :  { %1434 = vmatprep.subr.bf16.mxu0 %v1601_v21 }
  0x23   :  { %1405 = vmatpush3.bf16.msra.mxu1 %v1594_v11 }
  0x24   :  { %1387 = vmatmul.mubr.msk.bf16.gmra.mrb[4].mxu0 %vm112_vm1, %v1586_v8  ;;  %1406 = vmatprep.subr.bf16.mxu1 %v1595_v13 }
  0x25   :  { %1390 = vmatprep.mubr.msk.bf16.mxu0 %vm112_vm1, %v1587_v10  ;;  %1435 = vmatpush3.bf16.msra.mxu0 %v1601_v21  ;;  %v1608_v21 = vld [vmem:[#allocation2 + $0x88] sm:$0xff]  }
  0x26   :  { %1436 = vmatprep.subr.bf16.mxu0 %v1602_v22 }
  0x27   :  { %1407 = vmatpush3.bf16.msra.mxu1 %v1595_v13 }
  0x28   :  { %1408 = vmatprep.subr.bf16.mxu1 %v1596_v15 }
  0x29   :  { %1437 = vmatpush3.bf16.msra.mxu0 %v1602_v22  ;;  %v1609_v22 = vld [vmem:[#allocation2 + $0x90] sm:$0xff]  }
  0x2a   :  { %1438 = vmatprep.subr.bf16.mxu0 %v1603_v23 }
  0x2b   :  { %1409 = vmatpush3.bf16.msra.mxu1 %v1596_v15 }
  0x2c   :  { %1391 = vmatmul.mubr.msk.bf16.gmra.mrb[8].mxu0 %vm112_vm1, %v1588_v12  ;;  %1410 = vmatprep.subr.bf16.mxu1 %v1597_v17 }
  0x2d   :  { %1394 = vmatprep.mubr.msk.bf16.mxu0 %vm112_vm1, %v1589_v14  ;;  %1439 = vmatpush3.bf16.msra.mxu0 %v1603_v23  ;;  %v1610_v23 = vld [vmem:[#allocation2 + $0x98] sm:$0xff]  }
  0x2e   :  { %1440 = vmatprep.subr.bf16.mxu0 %v1604_v24 }
  0x2f   :  { %1411 = vmatpush3.bf16.msra.mxu1 %v1597_v17 }
  0x30   :  { %1412 = vmatprep.subr.bf16.mxu1 %v1598_v18 }
  0x31   :  { %1441 = vmatpush3.bf16.msra.mxu0 %v1604_v24  ;;  %v1611_v24 = vld [vmem:[#allocation2 + $0xa0] sm:$0xff]  }
  0x33   :  { %1413 = vmatpush3.bf16.msra.mxu1 %v1598_v18  ;;  %v1605_v18 = vld [vmem:[#allocation2 + $0x70] sm:$0xff]  }
  0x34   :  { %1395 = vmatmul.mubr.msk.bf16.gmra.mrb[12].mxu0 %vm112_vm1, %v1590_v16  ;;  %1442 = vmatprep.subr.bf16.mxu0 %v1605_v18 }
  0x35   :  { %1443 = vmatpush3.bf16.msra.mxu0 %v1605_v18  ;;  %1462 = vmatprep.subr.bf16.mxu1 %v1607_v20 }
  0x36   :  { %1444 = vmatprep.subr.bf16.mxu0 %v1606_v19 }
  0x39   :  { %1445 = vmatpush3.bf16.msra.mxu0 %v1606_v19  ;;  %v1613_v19 = vld [vmem:[#allocation2 + $0xb0] sm:$0xff]  }
  0xef   :  { %v1384_v26 = vpop.f32.mrb[0].mxu0 }
  0xf0   :  { %v184_v27 = vadd.f32 %v1384_v26, %v1224_v25  ;;  %v175_v28 = vpop.f32.mrb[1].mxu0  ;;  %v1243_v26 = vld [vmem:[%s1859_s4 + $0x1] ss:$0 sm:$0xff] }
  0xf1   :  { %v176_v29 = vadd.f32 %v1224_v25, %v175_v28  ;;  %v1385_v30 = vpop.f32.mrb[2].mxu0 }
  0xf2   :  { %v187_v31 = vadd.f32 %v1385_v30, %v1224_v25  ;;  %v178_v32 = vpop.f32.mrb[3].mxu0  ;;  %v240_v34 = vmax.f32 %v184_v27, 0.0 }
  0xf3   :  { %v179_v33 = vadd.f32 %v1224_v25, %v178_v32  ;;  %v238_v36 = vmax.f32 %v176_v29, 0.0 }
  0xf4   :  { %v241_v35 = vmax.f32 %v187_v31, 0.0 }
  0xf5   :  { %v239_v37 = vmax.f32 %v179_v33, 0.0 }
  0xf6   :  { %v255_v38 = vpack.c.bf16 %v241_v35, %v240_v34 }
  0xf7   :  { %v1388_v39 = vpop.f32.mrb[4].mxu0  ;;  %v254_v40 = vpack.c.bf16 %v239_v37, %v238_v36 }
  0xf8   :  { %v200_v41 = vadd.f32 %v1388_v39, %v1224_v25  ;;  %v191_v42 = vpop.f32.mrb[5].mxu0 }
  0xf9   :  { %v192_v43 = vadd.f32 %v1224_v25, %v191_v42  ;;  %v1389_v44 = vpop.f32.mrb[6].mxu0  ;;  %1414 = vmatprep.mubr.bf16.mxu1 %v254_v40 }
  0xfa   :  { %v203_v45 = vadd.f32 %v1389_v44, %v1224_v25  ;;  %v194_v46 = vpop.f32.mrb[7].mxu0  ;;  %1415 = vmatmul.mubr.bf16.vlgmr.msra.gmra.mrb[0].mxu1 %v255_v38  ;;  %v244_v48 = vmax.f32 %v200_v41, 0.0 }
  0xfb   :  { %v195_v47 = vadd.f32 %v1224_v25, %v194_v46  ;;  %v242_v50 = vmax.f32 %v192_v43, 0.0  ;;  %1463 = vmatpush3.bf16.msra.mxu1 %v1607_v20  ;;  %v1614_v20 = vld [vmem:[#allocation2 + $0xb8] sm:$0xff]  }
  0xfc   :  { %v245_v49 = vmax.f32 %v203_v45, 0.0  ;;  %1464 = vmatprep.subr.bf16.mxu1 %v1608_v21 }
  0xfd   :  { %v243_v51 = vmax.f32 %v195_v47, 0.0 }
  0xfe   :  { %v257_v52 = vpack.c.bf16 %v245_v49, %v244_v48 }
  0xff   :  { %v256_v53 = vpack.c.bf16 %v243_v51, %v242_v50  ;;  %v1392_v54 = vpop.f32.mrb[8].mxu0  ;;  %1465 = vmatpush3.bf16.msra.mxu1 %v1608_v21  ;;  %v1615_v21 = vld [vmem:[#allocation2 + $0xc0] sm:$0xff]  }
 0x100   :  { %v216_v55 = vadd.f32 %v1392_v54, %v1224_v25  ;;  %v207_v56 = vpop.f32.mrb[9].mxu0  ;;  %1466 = vmatprep.subr.bf16.mxu1 %v1609_v22  ;;  %1494 = vmatprep.subr.bf16.mxu0 %v1615_v21 }
 0x101   :  { %v208_v57 = vadd.f32 %v1224_v25, %v207_v56  ;;  %v1393_v58 = vpop.f32.mrb[10].mxu0  ;;  %1418 = vmatprep.mubr.bf16.mxu1 %v256_v53 }
 0x102   :  { %v219_v59 = vadd.f32 %v1393_v58, %v1224_v25  ;;  %v210_v60 = vpop.f32.mrb[11].mxu0  ;;  %1419 = vmatmul.mubr.bf16.gmra.mrb[4].mxu1 %v257_v52  ;;  %v248_v62 = vmax.f32 %v216_v55, 0.0 }
 0x103   :  { %v211_v61 = vadd.f32 %v1224_v25, %v210_v60  ;;  %v246_v0 = vmax.f32 %v208_v57, 0.0  ;;  %1467 = vmatpush3.bf16.msra.mxu1 %v1609_v22  ;;  %v1616_v22 = vld [vmem:[#allocation2 + $0xc8] sm:$0xff]  }
 0x104   :  { %v249_v63 = vmax.f32 %v219_v59, 0.0  ;;  %1468 = vmatprep.subr.bf16.mxu1 %v1610_v23 }
 0x105   :  { %v247_v1 = vmax.f32 %v211_v61, 0.0 }
 0x106   :  { %v259_v2 = vpack.c.bf16 %v249_v63, %v248_v62 }
 0x107   :  { %v258_v3 = vpack.c.bf16 %v247_v1, %v246_v0  ;;  %v1396_v4 = vpop.f32.mrb[12].mxu0  ;;  %1469 = vmatpush3.bf16.msra.mxu1 %v1610_v23  ;;  %v1617_v23 = vld [vmem:[#allocation2 + $0xd0] sm:$0xff]  }
 0x108   :  { %v232_v5 = vadd.f32 %v1396_v4, %v1224_v25  ;;  %v223_v6 = vpop.f32.mrb[13].mxu0  ;;  %1470 = vmatprep.subr.bf16.mxu1 %v1611_v24 }
 0x109   :  { %v224_v7 = vadd.f32 %v1224_v25, %v223_v6  ;;  %v1397_v8 = vpop.f32.mrb[14].mxu0  ;;  %1422 = vmatprep.mubr.bf16.mxu1 %v258_v3 }
 0x10a   :  { %v235_v9 = vadd.f32 %v1397_v8, %v1224_v25  ;;  %v226_v10 = vpop.f32.mrb[15].mxu0  ;;  %1423 = vmatmul.mubr.bf16.gmra.mrb[8].mxu1 %v259_v2  ;;  %v252_v12 = vmax.f32 %v232_v5, 0.0 }
 0x10b   :  { %v227_v11 = vadd.f32 %v1224_v25, %v226_v10  ;;  %v250_v14 = vmax.f32 %v224_v7, 0.0  ;;  %v1612_v25 = vld [vmem:[#allocation2 + $0xa8] sm:$0xff]   ;;  %1471 = vmatpush3.bf16.msra.mxu1 %v1611_v24  ;;  %v1618_v24 = vld [vmem:[#allocation2 + $0xd8] sm:$0xff]  }
 0x10c   :  { %v253_v13 = vmax.f32 %v235_v9, 0.0  ;;  %1472 = vmatprep.subr.bf16.mxu1 %v1612_v25 }
 0x10d   :  { %v251_v15 = vmax.f32 %v227_v11, 0.0 }
 0x10e   :  { %v261_v16 = vpack.c.bf16 %v253_v13, %v252_v12 }
 0x10f   :  { %v260_v17 = vpack.c.bf16 %v251_v15, %v250_v14  ;;  %1473 = vmatpush3.bf16.msra.mxu1 %v1612_v25  ;;  %v1619_v25 = vld [vmem:[#allocation2 + $0xe0] sm:$0xff]  }
 0x110   :  { %1474 = vmatprep.subr.bf16.mxu1 %v1613_v19 }
 0x111   :  { %1426 = vmatprep.mubr.bf16.mxu1 %v260_v17 }
 0x112   :  { %1427 = vmatmul.mubr.bf16.gmra.mrb[12].mxu1 %v261_v16 }
 0x113   :  { %1475 = vmatpush3.bf16.msra.mxu1 %v1613_v19 }
 0x114   :  { %1476 = vmatprep.subr.bf16.mxu1 %v1614_v20 }
 0x117   :  { %1477 = vmatpush3.bf16.msra.mxu1 %v1614_v20  ;;  %v1621_v20 = vld [vmem:[#allocation2 + $0xf0] sm:$0xff]  }
 0x1cd   :  { %v1416_v27 = vpop.f32.mrb[0].mxu1 }
 0x1ce   :  { %v374_v28 = vadd.f32 %v1416_v27, %v1243_v26  ;;  %v365_v29 = vpop.f32.mrb[1].mxu1  ;;  %v1252_v27 = vld [vmem:[%s1859_s4 + $0x2] ss:$0 sm:$0xff] }
 0x1cf   :  { %v366_v30 = vadd.f32 %v1243_v26, %v365_v29  ;;  %v1417_v31 = vpop.f32.mrb[2].mxu1 }
 0x1d0   :  { %v377_v32 = vadd.f32 %v1417_v31, %v1243_v26  ;;  %v368_v33 = vpop.f32.mrb[3].mxu1  ;;  %v430_v35 = vmax.f32 %v374_v28, 0.0 }
 0x1d1   :  { %v369_v34 = vadd.f32 %v1243_v26, %v368_v33  ;;  %v428_v37 = vmax.f32 %v366_v30, 0.0 }
 0x1d2   :  { %v431_v36 = vmax.f32 %v377_v32, 0.0 }
 0x1d3   :  { %v429_v38 = vmax.f32 %v369_v34, 0.0 }
 0x1d4   :  { %v445_v39 = vpack.c.bf16 %v431_v36, %v430_v35 }
 0x1d5   :  { %v444_v40 = vpack.c.bf16 %v429_v38, %v428_v37  ;;  %v1420_v41 = vpop.f32.mrb[4].mxu1 }
 0x1d6   :  { %v390_v42 = vadd.f32 %v1420_v41, %v1243_v26  ;;  %v381_v43 = vpop.f32.mrb[5].mxu1 }
 0x1d7   :  { %v382_v44 = vadd.f32 %v1243_v26, %v381_v43  ;;  %v1421_v45 = vpop.f32.mrb[6].mxu1  ;;  %1446 = vmatprep.mubr.bf16.mxu0 %v444_v40 }
 0x1d8   :  { %v393_v46 = vadd.f32 %v1421_v45, %v1243_v26  ;;  %v384_v47 = vpop.f32.mrb[7].mxu1  ;;  %1447 = vmatmul.mubr.bf16.vlgmr.msra.gmra.mrb[16].mxu0 %v445_v39  ;;  %v434_v49 = vmax.f32 %v390_v42, 0.0 }
 0x1d9   :  { %v385_v48 = vadd.f32 %v1243_v26, %v384_v47  ;;  %v432_v51 = vmax.f32 %v382_v44, 0.0  ;;  %1495 = vmatpush3.bf16.msra.mxu0 %v1615_v21  ;;  %v1622_v21 = vld [vmem:[#allocation2 + $0xf8] sm:$0xff]  }
 0x1da   :  { %v435_v50 = vmax.f32 %v393_v46, 0.0  ;;  %1496 = vmatprep.subr.bf16.mxu0 %v1616_v22 }
 0x1db   :  { %v433_v52 = vmax.f32 %v385_v48, 0.0 }
 0x1dc   :  { %v447_v53 = vpack.c.bf16 %v435_v50, %v434_v49 }
 0x1dd   :  { %v446_v54 = vpack.c.bf16 %v433_v52, %v432_v51  ;;  %v1424_v55 = vpop.f32.mrb[8].mxu1  ;;  %1497 = vmatpush3.bf16.msra.mxu0 %v1616_v22  ;;  %v1623_v22 = vld [vmem:[%s1858_s3] sm:$0xff]  }
 0x1de   :  { %v406_v56 = vadd.f32 %v1424_v55, %v1243_v26  ;;  %v397_v57 = vpop.f32.mrb[9].mxu1  ;;  %1498 = vmatprep.subr.bf16.mxu0 %v1617_v23  ;;  %1558 = vmatprep.subr.bf16.mxu1 %v1623_v22 }
 0x1df   :  { %v398_v58 = vadd.f32 %v1243_v26, %v397_v57  ;;  %v1425_v59 = vpop.f32.mrb[10].mxu1  ;;  %1450 = vmatprep.mubr.bf16.mxu0 %v446_v54 }
 0x1e0   :  { %v409_v60 = vadd.f32 %v1425_v59, %v1243_v26  ;;  %v400_v61 = vpop.f32.mrb[11].mxu1  ;;  %1451 = vmatmul.mubr.bf16.gmra.mrb[20].mxu0 %v447_v53  ;;  %v438_v63 = vmax.f32 %v406_v56, 0.0 }
 0x1e1   :  { %v401_v62 = vadd.f32 %v1243_v26, %v400_v61  ;;  %v436_v1 = vmax.f32 %v398_v58, 0.0  ;;  %1499 = vmatpush3.bf16.msra.mxu0 %v1617_v23  ;;  %v1624_v23 = vld [vmem:[%s1858_s3 + $0x8] sm:$0xff]  }
 0x1e2   :  { %v439_v0 = vmax.f32 %v409_v60, 0.0  ;;  %1500 = vmatprep.subr.bf16.mxu0 %v1618_v24 }
 0x1e3   :  { %v437_v2 = vmax.f32 %v401_v62, 0.0 }
 0x1e4   :  { %v449_v3 = vpack.c.bf16 %v439_v0, %v438_v63 }
 0x1e5   :  { %v448_v4 = vpack.c.bf16 %v437_v2, %v436_v1  ;;  %v1428_v5 = vpop.f32.mrb[12].mxu1  ;;  %1501 = vmatpush3.bf16.msra.mxu0 %v1618_v24  ;;  %v1625_v24 = vld [vmem:[%s1858_s3 + $0x10] sm:$0xff]  }
 0x1e6   :  { %v422_v6 = vadd.f32 %v1428_v5, %v1243_v26  ;;  %v413_v7 = vpop.f32.mrb[13].mxu1  ;;  %1502 = vmatprep.subr.bf16.mxu0 %v1619_v25 }
 0x1e7   :  { %v414_v8 = vadd.f32 %v1243_v26, %v413_v7  ;;  %v1429_v9 = vpop.f32.mrb[14].mxu1  ;;  %1454 = vmatprep.mubr.bf16.mxu0 %v448_v4 }
 0x1e8   :  { %v425_v10 = vadd.f32 %v1429_v9, %v1243_v26  ;;  %v416_v11 = vpop.f32.mrb[15].mxu1  ;;  %1455 = vmatmul.mubr.bf16.gmra.mrb[24].mxu0 %v449_v3  ;;  %v442_v13 = vmax.f32 %v422_v6, 0.0 }
 0x1e9   :  { %v417_v12 = vadd.f32 %v1243_v26, %v416_v11  ;;  %v440_v15 = vmax.f32 %v414_v8, 0.0  ;;  %v1620_v26 = vld [vmem:[#allocation2 + $0xe8] sm:$0xff]   ;;  %1503 = vmatpush3.bf16.msra.mxu0 %v1619_v25  ;;  %v1786_v25 = vld [vmem:[%s1858_s3 + $0x18] sm:$0xff]  }
 0x1ea   :  { %v443_v14 = vmax.f32 %v425_v10, 0.0  ;;  %1504 = vmatprep.subr.bf16.mxu0 %v1620_v26 }
 0x1eb   :  { %v441_v16 = vmax.f32 %v417_v12, 0.0 }
 0x1ec   :  { %v451_v17 = vpack.c.bf16 %v443_v14, %v442_v13 }
 0x1ed   :  { %v450_v18 = vpack.c.bf16 %v441_v16, %v440_v15  ;;  %1505 = vmatpush3.bf16.msra.mxu0 %v1620_v26  ;;  %v1792_v26 = vld [vmem:[%s1858_s3 + $0x20] sm:$0xff]  }
 0x1ee   :  { %1506 = vmatprep.subr.bf16.mxu0 %v1621_v20 }
 0x1ef   :  { %1458 = vmatprep.mubr.bf16.mxu0 %v450_v18 }
 0x1f0   :  { %1459 = vmatmul.mubr.bf16.gmra.mrb[28].mxu0 %v451_v17 }
 0x1f1   :  { %1507 = vmatpush3.bf16.msra.mxu0 %v1621_v20 }
 0x1f2   :  { %1508 = vmatprep.subr.bf16.mxu0 %v1622_v21 }
 0x1f5   :  { %1509 = vmatpush3.bf16.msra.mxu0 %v1622_v21  ;;  %v1629_v21 = vld [vmem:[%s1858_s3 + $0x30] sm:$0xff]  }
 0x1f6   :  { %1526 = vmatprep.subr.bf16.mxu0 %v1623_v22 }
 0x2ab   :  { %v1448_v28 = vpop.f32.mrb[16].mxu0 }
 0x2ac   :  { %v565_v29 = vadd.f32 %v1448_v28, %v1252_v27  ;;  %v556_v30 = vpop.f32.mrb[17].mxu0  ;;  %v1807_v28 = vld [vmem:[%s1859_s4 + $0x3] ss:$0 sm:$0xff] }
 0x2ad   :  { %v557_v31 = vadd.f32 %v1252_v27, %v556_v30  ;;  %v1449_v32 = vpop.f32.mrb[18].mxu0 }
 0x2ae   :  { %v568_v33 = vadd.f32 %v1449_v32, %v1252_v27  ;;  %v559_v34 = vpop.f32.mrb[19].mxu0  ;;  %v621_v36 = vmax.f32 %v565_v29, 0.0 }
 0x2af   :  { %v560_v35 = vadd.f32 %v1252_v27, %v559_v34  ;;  %v619_v38 = vmax.f32 %v557_v31, 0.0 }
 0x2b0   :  { %v622_v37 = vmax.f32 %v568_v33, 0.0 }
 0x2b1   :  { %v620_v39 = vmax.f32 %v560_v35, 0.0 }
 0x2b2   :  { %v636_v40 = vpack.c.bf16 %v622_v37, %v621_v36 }
 0x2b3   :  { %v635_v41 = vpack.c.bf16 %v620_v39, %v619_v38  ;;  %v1452_v42 = vpop.f32.mrb[20].mxu0 }
 0x2b4   :  { %v581_v43 = vadd.f32 %v1452_v42, %v1252_v27  ;;  %v572_v44 = vpop.f32.mrb[21].mxu0 }
 0x2b5   :  { %v573_v45 = vadd.f32 %v1252_v27, %v572_v44  ;;  %v1453_v46 = vpop.f32.mrb[22].mxu0  ;;  %1478 = vmatprep.mubr.bf16.mxu1 %v635_v41 }
 0x2b6   :  { %v584_v47 = vadd.f32 %v1453_v46, %v1252_v27  ;;  %v575_v48 = vpop.f32.mrb[23].mxu0  ;;  %1479 = vmatmul.mubr.bf16.vlgmr.msra.gmra.mrb[16].mxu1 %v636_v40  ;;  %v625_v50 = vmax.f32 %v581_v43, 0.0 }
 0x2b7   :  { %v576_v49 = vadd.f32 %v1252_v27, %v575_v48  ;;  %v623_v52 = vmax.f32 %v573_v45, 0.0  ;;  %1566 = vmatpush3.bf16.msra.mxu1 %v1623_v22 }
 0x2b8   :  { %v626_v51 = vmax.f32 %v584_v47, 0.0  ;;  %1559 = vmatprep.subr.bf16.mxu1 %v1624_v23 }
 0x2b9   :  { %v624_v53 = vmax.f32 %v576_v49, 0.0 }
 0x2ba   :  { %v638_v54 = vpack.c.bf16 %v626_v51, %v625_v50 }
 0x2bb   :  { %v637_v55 = vpack.c.bf16 %v624_v53, %v623_v52  ;;  %v1456_v56 = vpop.f32.mrb[24].mxu0  ;;  %1567 = vmatpush3.bf16.msra.mxu1 %v1624_v23 }
 0x2bc   :  { %v597_v57 = vadd.f32 %v1456_v56, %v1252_v27  ;;  %v588_v58 = vpop.f32.mrb[25].mxu0  ;;  %1560 = vmatprep.subr.bf16.mxu1 %v1625_v24 }
 0x2bd   :  { %v589_v59 = vadd.f32 %v1252_v27, %v588_v58  ;;  %v1457_v60 = vpop.f32.mrb[26].mxu0  ;;  %1482 = vmatprep.mubr.bf16.mxu1 %v637_v55 }
 0x2be   :  { %v600_v61 = vadd.f32 %v1457_v60, %v1252_v27  ;;  %v591_v62 = vpop.f32.mrb[27].mxu0  ;;  %1483 = vmatmul.mubr.bf16.gmra.mrb[20].mxu1 %v638_v54  ;;  %v629_v0 = vmax.f32 %v597_v57, 0.0 }
 0x2bf   :  { %v592_v63 = vadd.f32 %v1252_v27, %v591_v62  ;;  %v627_v2 = vmax.f32 %v589_v59, 0.0  ;;  %1568 = vmatpush3.bf16.msra.mxu1 %v1625_v24 }
 0x2c0   :  { %v630_v1 = vmax.f32 %v600_v61, 0.0  ;;  %1561 = vmatprep.subr.bf16.mxu1 %v1786_v25 }
 0x2c1   :  { %v628_v3 = vmax.f32 %v592_v63, 0.0 }
 0x2c2   :  { %v640_v4 = vpack.c.bf16 %v630_v1, %v629_v0 }
 0x2c3   :  { %v639_v5 = vpack.c.bf16 %v628_v3, %v627_v2  ;;  %v1460_v6 = vpop.f32.mrb[28].mxu0  ;;  %1569 = vmatpush3.bf16.msra.mxu1 %v1786_v25 }
 0x2c4   :  { %v613_v7 = vadd.f32 %v1460_v6, %v1252_v27  ;;  %v604_v8 = vpop.f32.mrb[29].mxu0  ;;  %1562 = vmatprep.subr.bf16.mxu1 %v1792_v26 }
 0x2c5   :  { %v605_v9 = vadd.f32 %v1252_v27, %v604_v8  ;;  %v1461_v10 = vpop.f32.mrb[30].mxu0  ;;  %1486 = vmatprep.mubr.bf16.mxu1 %v639_v5 }
 0x2c6   :  { %v616_v11 = vadd.f32 %v1461_v10, %v1252_v27  ;;  %v607_v12 = vpop.f32.mrb[31].mxu0  ;;  %1487 = vmatmul.mubr.bf16.gmra.mrb[24].mxu1 %v640_v4  ;;  %v633_v14 = vmax.f32 %v613_v7, 0.0 }
 0x2c7   :  { %v608_v13 = vadd.f32 %v1252_v27, %v607_v12  ;;  %v631_v16 = vmax.f32 %v605_v9, 0.0  ;;  %v1799_v27 = vld [vmem:[%s1858_s3 + $0x28] sm:$0xff]   ;;  %1570 = vmatpush3.bf16.msra.mxu1 %v1792_v26 }
 0x2c8   :  { %v634_v15 = vmax.f32 %v616_v11, 0.0  ;;  %1563 = vmatprep.subr.bf16.mxu1 %v1799_v27 }
 0x2c9   :  { %v632_v17 = vmax.f32 %v608_v13, 0.0 }
 0x2ca   :  { %v642_v18 = vpack.c.bf16 %v634_v15, %v633_v14 }
 0x2cb   :  { %v641_v19 = vpack.c.bf16 %v632_v17, %v631_v16  ;;  %1571 = vmatpush3.bf16.msra.mxu1 %v1799_v27 }
 0x2cc   :  { %1564 = vmatprep.subr.bf16.mxu1 %v1629_v21 }
 0x2cd   :  { %1490 = vmatprep.mubr.bf16.mxu1 %v641_v19 }
 0x2ce   :  { %1491 = vmatmul.mubr.bf16.gmra.mrb[28].mxu1 %v642_v18 }
 0x2cf   :  { %1572 = vmatpush3.bf16.msra.mxu1 %v1629_v21 }
 0x389   :  { %v1480_v29 = vpop.f32.mrb[16].mxu1 }
 0x38a   :  { %v756_v30 = vadd.f32 %v1480_v29, %v1807_v28  ;;  %v747_v31 = vpop.f32.mrb[17].mxu1 }
 0x38b   :  { %v748_v32 = vadd.f32 %v1807_v28, %v747_v31  ;;  %v1481_v33 = vpop.f32.mrb[18].mxu1 }
 0x38c   :  { %v759_v34 = vadd.f32 %v1481_v33, %v1807_v28  ;;  %v750_v35 = vpop.f32.mrb[19].mxu1  ;;  %v812_v37 = vmax.f32 %v756_v30, 0.0 }
 0x38d   :  { %v751_v36 = vadd.f32 %v1807_v28, %v750_v35  ;;  %v810_v39 = vmax.f32 %v748_v32, 0.0 }
 0x38e   :  { %v813_v38 = vmax.f32 %v759_v34, 0.0 }
 0x38f   :  { %v811_v40 = vmax.f32 %v751_v36, 0.0 }
 0x390   :  { %v827_v41 = vpack.c.bf16 %v813_v38, %v812_v37 }
 0x391   :  { %v826_v42 = vpack.c.bf16 %v811_v40, %v810_v39  ;;  %v1484_v43 = vpop.f32.mrb[20].mxu1 }
 0x392   :  { %v772_v44 = vadd.f32 %v1484_v43, %v1807_v28  ;;  %v763_v45 = vpop.f32.mrb[21].mxu1 }
 0x393   :  { %v764_v46 = vadd.f32 %v1807_v28, %v763_v45  ;;  %v1485_v47 = vpop.f32.mrb[22].mxu1  ;;  %1510 = vmatprep.mubr.bf16.mxu0 %v826_v42 }
 0x394   :  { %v775_v48 = vadd.f32 %v1485_v47, %v1807_v28  ;;  %v766_v49 = vpop.f32.mrb[23].mxu1  ;;  %1511 = vmatmul.mubr.bf16.vlgmr.msra.gmra.mrb[32].mxu0 %v827_v41  ;;  %v816_v51 = vmax.f32 %v772_v44, 0.0 }
 0x395   :  { %v767_v50 = vadd.f32 %v1807_v28, %v766_v49  ;;  %1527 = vmatpush3.bf16.msra.mxu0 %v1623_v22  ;;  %v814_v53 = vmax.f32 %v764_v46, 0.0  ;;  %v1630_v22 = vld [vmem:[%s1858_s3 + $0x38] sm:$0xff]  }
 0x396   :  { %v817_v52 = vmax.f32 %v775_v48, 0.0  ;;  %1528 = vmatprep.subr.bf16.mxu0 %v1624_v23  ;;  %1565 = vmatprep.subr.bf16.mxu1 %v1630_v22 }
 0x397   :  { %v815_v54 = vmax.f32 %v767_v50, 0.0  ;;  %1573 = vmatpush3.bf16.msra.mxu1 %v1630_v22 }
 0x398   :  { %v829_v55 = vpack.c.bf16 %v817_v52, %v816_v51 }
 0x399   :  { %v828_v56 = vpack.c.bf16 %v815_v54, %v814_v53  ;;  %v1488_v57 = vpop.f32.mrb[24].mxu1  ;;  %1529 = vmatpush3.bf16.msra.mxu0 %v1624_v23  ;;  %v1270_v23 = vld [vmem:[%s1859_s4 + $0x4] ss:$0 sm:$0xff] }
 0x39a   :  { %v788_v58 = vadd.f32 %v1488_v57, %v1807_v28  ;;  %v779_v59 = vpop.f32.mrb[25].mxu1  ;;  %1530 = vmatprep.subr.bf16.mxu0 %v1625_v24 }
 0x39b   :  { %v780_v60 = vadd.f32 %v1807_v28, %v779_v59  ;;  %v1489_v61 = vpop.f32.mrb[26].mxu1  ;;  %1514 = vmatprep.mubr.bf16.mxu0 %v828_v56 }
 0x39c   :  { %v791_v62 = vadd.f32 %v1489_v61, %v1807_v28  ;;  %v782_v63 = vpop.f32.mrb[27].mxu1  ;;  %1515 = vmatmul.mubr.bf16.gmra.mrb[36].mxu0 %v829_v55  ;;  %v820_v1 = vmax.f32 %v788_v58, 0.0 }
 0x39d   :  { %v783_v0 = vadd.f32 %v1807_v28, %v782_v63  ;;  %1531 = vmatpush3.bf16.msra.mxu0 %v1625_v24  ;;  %v818_v3 = vmax.f32 %v780_v60, 0.0 }
 0x39e   :  { %v821_v2 = vmax.f32 %v791_v62, 0.0  ;;  %1532 = vmatprep.subr.bf16.mxu0 %v1786_v25 }
 0x39f   :  { %v819_v4 = vmax.f32 %v783_v0, 0.0 }
 0x3a0   :  { %v831_v5 = vpack.c.bf16 %v821_v2, %v820_v1 }
 0x3a1   :  { %v830_v6 = vpack.c.bf16 %v819_v4, %v818_v3  ;;  %v1492_v7 = vpop.f32.mrb[28].mxu1  ;;  %1533 = vmatpush3.bf16.msra.mxu0 %v1786_v25 }
 0x3a2   :  { %v804_v8 = vadd.f32 %v1492_v7, %v1807_v28  ;;  %v795_v9 = vpop.f32.mrb[29].mxu1  ;;  %1534 = vmatprep.subr.bf16.mxu0 %v1792_v26 }
 0x3a3   :  { %v796_v10 = vadd.f32 %v1807_v28, %v795_v9  ;;  %v1493_v11 = vpop.f32.mrb[30].mxu1  ;;  %1518 = vmatprep.mubr.bf16.mxu0 %v830_v6 }
 0x3a4   :  { %v807_v12 = vadd.f32 %v1493_v11, %v1807_v28  ;;  %v798_v13 = vpop.f32.mrb[31].mxu1  ;;  %1519 = vmatmul.mubr.bf16.gmra.mrb[40].mxu0 %v831_v5  ;;  %v824_v15 = vmax.f32 %v804_v8, 0.0 }
 0x3a5   :  { %v799_v14 = vadd.f32 %v1807_v28, %v798_v13  ;;  %1535 = vmatpush3.bf16.msra.mxu0 %v1792_v26  ;;  %v822_v17 = vmax.f32 %v796_v10, 0.0 }
 0x3a6   :  { %v825_v16 = vmax.f32 %v807_v12, 0.0  ;;  %1536 = vmatprep.subr.bf16.mxu0 %v1799_v27 }
 0x3a7   :  { %v823_v18 = vmax.f32 %v799_v14, 0.0 }
 0x3a8   :  { %v833_v19 = vpack.c.bf16 %v825_v16, %v824_v15  ;;  %v1279_v16 = vld [vmem:[%s1859_s4 + $0x5] ss:$0 sm:$0xff]  ;;  %s1682_s4 = smov [#allocation5]  }
 0x3a9   :  { %v832_v20 = vpack.c.bf16 %v823_v18, %v822_v17  ;;  %1537 = vmatpush3.bf16.msra.mxu0 %v1799_v27  ;;  %s1212_s24 = sshll.u32 %s1682_s4, 4  ;;  %s1213_s24 = int_to_ptr.vmem [resolvable:$true] %s1212_s24 }
 0x3aa   :  { %1538 = vmatprep.subr.bf16.mxu0 %v1629_v21  ;;  %s1653_s0 = scalar_lea.vmem %s1213_s24, 2048  ;;  %p1658_p9 = scmp.lt.s32.totalorder %s1213_s24, %s1213_s24 }
 0x3ab   :  { %1522 = vmatprep.mubr.bf16.mxu0 %v832_v20  ;;  %p1654_p8 = scmp.ne.s32.totalorder %s1213_s24, %s1653_s0  ;;  %p1659_p10 = scmp.lt.s32.totalorder %s1653_s0, %s1653_s0 }
 0x3ac   :  { %1523 = vmatmul.mubr.bf16.gmra.mrb[44].mxu0 %v833_v19 }
 0x3ad   :  { %1539 = vmatpush3.bf16.msra.mxu0 %v1629_v21  ;;  %p1660_p11 = por %p1659_p10, %p1658_p9 }
 0x3ae   :  { %1540 = vmatprep.subr.bf16.mxu0 %v1630_v22 }
 0x3af   :  { %p1661_p12 = pnand %p1660_p11, %p1654_p8 }
 0x3b1   :  { %1541 = vmatpush3.bf16.msra.mxu0 %v1630_v22 }
 0x467   :  { %v1512_v24 = vpop.f32.mrb[32].mxu0 }
 0x468   :  { %v947_v25 = vadd.f32 %v1512_v24, %v1270_v23  ;;  %v938_v26 = vpop.f32.mrb[33].mxu0 }
 0x469   :  { %v939_v27 = vadd.f32 %v1270_v23, %v938_v26  ;;  %v1513_v28 = vpop.f32.mrb[34].mxu0 }
 0x46a   :  { %v950_v29 = vadd.f32 %v1513_v28, %v1270_v23  ;;  %v941_v30 = vpop.f32.mrb[35].mxu0  ;;  %v1003_v32 = vmax.f32 %v947_v25, 0.0 }
 0x46b   :  { %v942_v31 = vadd.f32 %v1270_v23, %v941_v30  ;;  %v1001_v34 = vmax.f32 %v939_v27, 0.0 }
 0x46c   :  { %v1004_v33 = vmax.f32 %v950_v29, 0.0 }
 0x46d   :  { %v1002_v35 = vmax.f32 %v942_v31, 0.0 }
 0x46e   :  { %v1018_v36 = vpack.c.bf16 %v1004_v33, %v1003_v32 }
 0x46f   :  { %v1017_v37 = vpack.c.bf16 %v1002_v35, %v1001_v34  ;;  %v1516_v38 = vpop.f32.mrb[36].mxu0 }
 0x470   :  { %v963_v39 = vadd.f32 %v1516_v38, %v1270_v23  ;;  %v954_v40 = vpop.f32.mrb[37].mxu0 }
 0x471   :  { %v955_v41 = vadd.f32 %v1270_v23, %v954_v40  ;;  %v1517_v42 = vpop.f32.mrb[38].mxu0  ;;  %1542 = vmatprep.mubr.bf16.mxu0 %v1017_v37 }
 0x472   :  { %v966_v43 = vadd.f32 %v1517_v42, %v1270_v23  ;;  %v957_v44 = vpop.f32.mrb[39].mxu0  ;;  %1543 = vmatmul.mubr.bf16.vlgmr.msra.gmra.mrb[48].mxu0 %v1018_v36  ;;  %v1007_v46 = vmax.f32 %v963_v39, 0.0 }
 0x473   :  { %v958_v45 = vadd.f32 %v1270_v23, %v957_v44  ;;  %v1005_v48 = vmax.f32 %v955_v41, 0.0 }
 0x474   :  { %v1008_v47 = vmax.f32 %v966_v43, 0.0 }
 0x475   :  { %v1006_v49 = vmax.f32 %v958_v45, 0.0 }
 0x476   :  { %v1020_v50 = vpack.c.bf16 %v1008_v47, %v1007_v46 }
 0x477   :  { %v1019_v51 = vpack.c.bf16 %v1006_v49, %v1005_v48  ;;  %v1520_v52 = vpop.f32.mrb[40].mxu0 }
 0x478   :  { %v979_v53 = vadd.f32 %v1520_v52, %v1270_v23  ;;  %v970_v54 = vpop.f32.mrb[41].mxu0 }
 0x479   :  { %v971_v55 = vadd.f32 %v1270_v23, %v970_v54  ;;  %v1521_v56 = vpop.f32.mrb[42].mxu0  ;;  %1546 = vmatprep.mubr.bf16.mxu1 %v1019_v51 }
 0x47a   :  { %v982_v57 = vadd.f32 %v1521_v56, %v1270_v23  ;;  %v973_v58 = vpop.f32.mrb[43].mxu0  ;;  %1547 = vmatmul.mubr.bf16.vlgmr.msra.gmra.mrb[32].mxu1 %v1020_v50  ;;  %v1011_v60 = vmax.f32 %v979_v53, 0.0 }
 0x47b   :  { %v974_v59 = vadd.f32 %v1270_v23, %v973_v58  ;;  %v1009_v62 = vmax.f32 %v971_v55, 0.0 }
 0x47c   :  { %v1012_v61 = vmax.f32 %v982_v57, 0.0 }
 0x47d   :  { %v1010_v63 = vmax.f32 %v974_v59, 0.0 }
 0x47e   :  { %v1022_v0 = vpack.c.bf16 %v1012_v61, %v1011_v60 }
 0x47f   :  { %v1021_v1 = vpack.c.bf16 %v1010_v63, %v1009_v62  ;;  %v1524_v2 = vpop.f32.mrb[44].mxu0 }
 0x480   :  { %v995_v3 = vadd.f32 %v1524_v2, %v1270_v23  ;;  %v986_v4 = vpop.f32.mrb[45].mxu0 }
 0x481   :  { %v987_v5 = vadd.f32 %v1270_v23, %v986_v4  ;;  %v1525_v6 = vpop.f32.mrb[46].mxu0  ;;  %1550 = vmatprep.mubr.bf16.mxu1 %v1021_v1 }
 0x482   :  { %v998_v7 = vadd.f32 %v1525_v6, %v1270_v23  ;;  %v989_v8 = vpop.f32.mrb[47].mxu0  ;;  %1551 = vmatmul.mubr.bf16.gmra.mrb[36].mxu1 %v1022_v0  ;;  %v1015_v10 = vmax.f32 %v995_v3, 0.0 }
 0x483   :  { %v990_v9 = vadd.f32 %v1270_v23, %v989_v8  ;;  %v1013_v12 = vmax.f32 %v987_v5, 0.0 }
 0x484   :  { %v1016_v11 = vmax.f32 %v998_v7, 0.0 }
 0x485   :  { %v1014_v13 = vmax.f32 %v990_v9, 0.0 }
 0x486   :  { %v1024_v14 = vpack.c.bf16 %v1016_v11, %v1015_v10 }
 0x487   :  { %v1023_v15 = vpack.c.bf16 %v1014_v13, %v1013_v12 }
 0x489   :  { %1554 = vmatprep.mubr.bf16.mxu1 %v1023_v15 }
 0x48a   :  { %1555 = vmatmul.mubr.bf16.gmra.mrb[40].mxu1 %v1024_v14 }
 0x545   :  { %v1544_v17 = vpop.f32.mrb[48].mxu0 }
 0x546   :  { %v1137_v18 = vadd.f32 %v1544_v17, %v1279_v16  ;;  %v1128_v19 = vpop.f32.mrb[49].mxu0 }
 0x547   :  { %v1129_v20 = vadd.f32 %v1279_v16, %v1128_v19  ;;  %v1545_v21 = vpop.f32.mrb[50].mxu0 }
 0x548   :  { %1193 = vst [vmem:[#allocation5 + $0x10] sm:$0xff] %v1137_v18  ;;  %v1140_v22 = vadd.f32 %v1545_v21, %v1279_v16  ;;  %v1131_v23 = vpop.f32.mrb[51].mxu0 }
 0x549   :  { %1191 = vst [vmem:[#allocation5] sm:$0xff] %v1129_v20  ;;  %v1132_v24 = vadd.f32 %v1279_v16, %v1131_v23 }
 0x54a   :  { %1194 = vst [vmem:[#allocation5 + $0x18] sm:$0xff] %v1140_v22 }
 0x54b   :  { %1192 = vst [vmem:[#allocation5 + $0x8] sm:$0xff] %v1132_v24 }
 0x54d   :  { %v1548_v25 = vpop.f32.mrb[32].mxu1 }
 0x54e   :  { %v1153_v26 = vadd.f32 %v1548_v25, %v1279_v16  ;;  %v1144_v27 = vpop.f32.mrb[33].mxu1 }
 0x54f   :  { %v1145_v28 = vadd.f32 %v1279_v16, %v1144_v27  ;;  %v1549_v29 = vpop.f32.mrb[34].mxu1 }
 0x550   :  { %1197 = vst [vmem:[#allocation5 + $0x30] sm:$0xff] %v1153_v26  ;;  %v1156_v30 = vadd.f32 %v1549_v29, %v1279_v16  ;;  %v1147_v31 = vpop.f32.mrb[35].mxu1 }
 0x551   :  { %1195 = vst [vmem:[#allocation5 + $0x20] sm:$0xff] %v1145_v28  ;;  %v1148_v32 = vadd.f32 %v1279_v16, %v1147_v31 }
 0x552   :  { %1198 = vst [vmem:[#allocation5 + $0x38] sm:$0xff] %v1156_v30 }
 0x553   :  { %1196 = vst [vmem:[#allocation5 + $0x28] sm:$0xff] %v1148_v32 }
 0x555   :  { %v1552_v33 = vpop.f32.mrb[36].mxu1 }
 0x556   :  { %v1169_v34 = vadd.f32 %v1552_v33, %v1279_v16  ;;  %v1160_v35 = vpop.f32.mrb[37].mxu1 }
 0x557   :  { %v1161_v36 = vadd.f32 %v1279_v16, %v1160_v35  ;;  %v1553_v37 = vpop.f32.mrb[38].mxu1 }
 0x558   :  { %1201 = vst [vmem:[#allocation5 + $0x50] sm:$0xff] %v1169_v34  ;;  %v1172_v38 = vadd.f32 %v1553_v37, %v1279_v16  ;;  %v1163_v39 = vpop.f32.mrb[39].mxu1 }
 0x559   :  { %1199 = vst [vmem:[#allocation5 + $0x40] sm:$0xff] %v1161_v36  ;;  %v1164_v40 = vadd.f32 %v1279_v16, %v1163_v39 }
 0x55a   :  { %1202 = vst [vmem:[#allocation5 + $0x58] sm:$0xff] %v1172_v38 }
 0x55b   :  { %1200 = vst [vmem:[#allocation5 + $0x48] sm:$0xff] %v1164_v40 }
 0x55d   :  { %v1556_v41 = vpop.f32.mrb[40].mxu1 }
 0x55e   :  { %v1185_v42 = vadd.f32 %v1556_v41, %v1279_v16  ;;  %v1176_v43 = vpop.f32.mrb[41].mxu1 }
 0x55f   :  { %v1177_v44 = vadd.f32 %v1279_v16, %v1176_v43  ;;  %v1557_v45 = vpop.f32.mrb[42].mxu1 }
 0x560   :  { %1205 = vst [vmem:[#allocation5 + $0x70] sm:$0xff] %v1185_v42  ;;  %v1188_v46 = vadd.f32 %v1557_v45, %v1279_v16  ;;  %v1179_v47 = vpop.f32.mrb[43].mxu1 }
 0x561   :  { %1203 = vst [vmem:[#allocation5 + $0x60] sm:$0xff] %v1177_v44  ;;  %v1180_v48 = vadd.f32 %v1279_v16, %v1179_v47 }
 0x562   :  { %1206 = vst [vmem:[#allocation5 + $0x78] sm:$0xff] %v1188_v46 }
 0x563   :  { %1204 = vst [vmem:[#allocation5 + $0x68] sm:$0xff] %v1180_v48 }
 0x564   :  { %1664 = shalt.err (!%p1661_p12)
}
 0x565   :  { %s1665_s27 = scalar_lea.hbm %s1860_s5, 2048 }
 0x566   :  { %p1666_p13 = scmp.ne.s32.totalorder %s1860_s5, %s1665_s27  ;;  %p1669_p0 = scmp.lt.u32.totalorder %s1665_s27, %s1860_s5 }
 0x568   :  { %p1671_p1 = pnand %p1669_p0, %p1666_p13 }
 0x56a   :  { %1674 = shalt.err (!%p1671_p1)
}
 0x56b   :  { %s1683_s7 = smov 128   ;;  %s1684_s8 = smov 8  }
 0x56c   :  { %1218 = dma.vmem_to_hbm [thread:$0]  %s1213_s24, 2048, %s1860_s5, [#allocation4], %s1683_s7, %s1683_s7, %s1684_s8  }
 0x56d   :  { %1677 = dma.done.wait [#allocation4], 2048  }
 0x56e   :  { %1678 = vsyncadd [#allocation4], 4294965248 }
 0x56f   :  { %1222 = vsyncpa [#allocation3], 1 }
 0x570   :  { %1223 = vsyncpa [#allocation4], 1 }

</bundles_post_ra>
